<compile_context>
chip_gen: v7x
topology: tpu7x:2x2x1
jax: 0.10.0
libtpu: 0.0.40
codegen_flags: <defaults>
</compile_context>

<pallas_src>
import functools

import jax
import jax.numpy as jnp
from jax import lax
from jax.experimental import pallas as pl
from jax.experimental.pallas import tpu as pltpu


def _bert_self_output_kernel(x_ref, w_ref, b_ref, resid_ref, gamma_ref,
                             beta_ref, o_ref, *, eps):
    # dense: y = x @ W^T + b. w_ref holds the original nn.Linear (out, in)
    # weight; contract the shared "in" axis (axis 1 of both operands) so no
    # host/HBM transpose pass is needed. bf16 operands, f32 accumulation.
    y = lax.dot_general(
        x_ref[...], w_ref[...],
        dimension_numbers=(((1,), (1,)), ((), ())),
        preferred_element_type=jnp.float32,
    ) + b_ref[...]

    # dropout: identity in eval / inference mode.
    # TODO(synk): training-mode dropout (hidden_dropout_prob) not applied.

    # residual add + LayerNorm over the hidden (lane) axis, all in f32.
    z = y + resid_ref[...].astype(jnp.float32)
    mean = jnp.mean(z, axis=-1, keepdims=True)
    centered = z - mean
    var = jnp.mean(centered * centered, axis=-1, keepdims=True)
    norm = centered * lax.rsqrt(var + eps)
    o_ref[...] = (norm * gamma_ref[...] + beta_ref[...]).astype(o_ref.dtype)


def _run(x2d, w, b2d, r2d, g2d, be2d, *, eps, tm, single_buffer_params):
    M, H = x2d.shape
    grid = (pl.cdiv(M, tm),)

    # Parameters have constant index maps -> a single VMEM buffer is enough
    # (avoids double-buffering the resident HxH weight; frees VMEM headroom,
    # which matters most on v7x's 64 MiB VMEM).
    param_kwargs = (
        dict(pipeline_mode=pl.Buffered(1)) if single_buffer_params else {}
    )

    in_specs = [
        pl.BlockSpec((tm, H), lambda i: (i, 0)),                   # x tile
        pl.BlockSpec((H, H), lambda i: (0, 0), **param_kwargs),    # W (out,in)
        pl.BlockSpec((1, H), lambda i: (0, 0), **param_kwargs),    # bias
        pl.BlockSpec((tm, H), lambda i: (i, 0)),                   # residual
        pl.BlockSpec((1, H), lambda i: (0, 0), **param_kwargs),    # gamma
        pl.BlockSpec((1, H), lambda i: (0, 0), **param_kwargs),    # beta
    ]

    return pl.pallas_call(
        functools.partial(_bert_self_output_kernel, eps=eps),
        out_shape=jax.ShapeDtypeStruct((M, H), jnp.bfloat16),
        grid_spec=pltpu.PrefetchScalarGridSpec(
            num_scalar_prefetch=0,
            grid=grid,
            in_specs=in_specs,
            out_specs=pl.BlockSpec((tm, H), lambda i: (i, 0)),
        ),
        # residual (input index 3) and output have identical shape/dtype ->
        # let XLA reuse the HBM buffer.
        input_output_aliases={3: 0},
        compiler_params=pltpu.CompilerParams(
            dimension_semantics=("parallel",),
            vmem_limit_bytes=32 * 1024 * 1024,
        ),
    )(x2d, w, b2d, r2d, g2d, be2d)


def bert_self_output(hidden_states, input_tensor, weight, bias, gamma, beta,
                     *, eps=1e-12, block_rows=512):
    """Fused BertSelfOutput forward.

    hidden_states, input_tensor: (B, S, H)
    weight: (H, H) laid out like torch.nn.Linear (out_features, in_features)
    bias / gamma / beta: (H,)
    Returns (B, S, H) in bfloat16.
    """
    B, S, H = hidden_states.shape
    M = B * S

    # bf16 on the memory-bound path (activations, residual, weight);
    # bias/gamma/beta stay f32 and are applied in f32 inside the kernel.
    x2d = hidden_states.reshape(M, H).astype(jnp.bfloat16)
    r2d = input_tensor.reshape(M, H).astype(jnp.bfloat16)
    w = weight.astype(jnp.bfloat16)                     # keep (out, in) layout
    b2d = bias.astype(jnp.float32).reshape(1, H)
    g2d = gamma.astype(jnp.float32).reshape(1, H)
    be2d = beta.astype(jnp.float32).reshape(1, H)

    # Row tile: big (default 512 = full MXU height on v6e/v7x, 4x on v5e) to
    # amortize the ~0.35 us/step pipeline overhead. block_rows is a multiple
    # of 16 (bf16 sublane packing); for tiny M a single full-extent block is
    # always a legal tile shape.
    tm = M if M <= block_rows else block_rows

    try:
        out = _run(x2d, w, b2d, r2d, g2d, be2d, eps=eps, tm=tm,
                   single_buffer_params=True)
    except Exception:
        # Fallback for jax versions without BlockSpec(pipeline_mode=...)
        # support on the top-level TPU pipeline — identical kernel, default
        # double-buffered parameter specs.
        out = _run(x2d, w, b2d, r2d, g2d, be2d, eps=eps, tm=tm,
                   single_buffer_params=False)

    return out.reshape(B, S, H)


def _reference(hidden_states, input_tensor, weight, bias, gamma, beta, eps):
    # f32 reference using the same bf16-cast matmul operands the kernel sees.
    x = hidden_states.astype(jnp.float32)
    r = input_tensor.astype(jnp.float32)
    w = weight.astype(jnp.bfloat16).astype(jnp.float32)
    y = jnp.einsum("bsh,oh->bso", x, w) + bias
    z = y + r
    mean = jnp.mean(z, axis=-1, keepdims=True)
    var = jnp.mean((z - mean) ** 2, axis=-1, keepdims=True)
    return (z - mean) / jnp.sqrt(var + eps) * gamma + beta


if __name__ == "__main__":
    B, S, H = 2, 8, 32
    eps = 1e-12

    key = jax.random.PRNGKey(0)
    k_hs, k_in, k_w, k_b, k_g, k_be = jax.random.split(key, 6)

    hidden_states = jax.random.normal(k_hs, (B, S, H),
                                      dtype=jnp.float32).astype(jnp.bfloat16)
    input_tensor = jax.random.normal(k_in, (B, S, H),
                                     dtype=jnp.float32).astype(jnp.bfloat16)
    # deterministic synthetic parameters (torch nn.Linear layout: (out, in))
    weight = jax.random.normal(k_w, (H, H), dtype=jnp.float32) * 0.02
    bias = jax.random.normal(k_b, (H,), dtype=jnp.float32) * 0.01
    gamma = 1.0 + 0.1 * jax.random.normal(k_g, (H,), dtype=jnp.float32)
    beta = 0.1 * jax.random.normal(k_be, (H,), dtype=jnp.float32)

    out = bert_self_output(hidden_states, input_tensor, weight, bias,
                           gamma, beta, eps=eps)
    out = jax.block_until_ready(out)

    ref = _reference(hidden_states, input_tensor, weight, bias, gamma, beta, eps)

    assert out.shape == (B, S, H)
    assert out.dtype == jnp.bfloat16
    assert jnp.allclose(out.astype(jnp.float32), ref, atol=5e-2, rtol=5e-2), (
        "mismatch vs reference: max abs err = "
        f"{jnp.max(jnp.abs(out.astype(jnp.float32) - ref))}")

    print("KERNEL_OK")
</pallas_src>

<mosaic_0001>
module attributes {stable_mosaic.version = 11 : i64} {
  func.func @_bert_self_output_kernel(%arg0: i32, %arg1: memref<16x32xbf16, #tpu.memory_space<vmem>>, %arg2: memref<32x32xbf16, #tpu.memory_space<vmem>>, %arg3: memref<1x32xf32, #tpu.memory_space<vmem>>, %arg4: memref<16x32xbf16, #tpu.memory_space<vmem>>, %arg5: memref<1x32xf32, #tpu.memory_space<vmem>>, %arg6: memref<1x32xf32, #tpu.memory_space<vmem>>, %arg7: memref<16x32xbf16, #tpu.memory_space<vmem>>) attributes {dimension_semantics = [#tpu.dimension_semantics<parallel>], iteration_bounds = array<i64: 1>, scalar_prefetch = 0 : i64, scratch_operands = 0 : i64, tpu.core_type = #tpu.core_type<tc>, window_params = [{transform_indices = @transform_0, window_bounds = array<i64: 16, 32>}, {pipeline_mode = #tpu.pipeline_mode<synchronous>, transform_indices = @transform_1, window_bounds = array<i64: 32, 32>}, {pipeline_mode = #tpu.pipeline_mode<synchronous>, transform_indices = @transform_2, window_bounds = array<i64: 1, 32>}, {transform_indices = @transform_3, window_bounds = array<i64: 16, 32>}, {pipeline_mode = #tpu.pipeline_mode<synchronous>, transform_indices = @transform_4, window_bounds = array<i64: 1, 32>}, {pipeline_mode = #tpu.pipeline_mode<synchronous>, transform_indices = @transform_5, window_bounds = array<i64: 1, 32>}, {transform_indices = @transform_6, window_bounds = array<i64: 16, 32>}]} {
    %c0 = arith.constant 0 : index
    %c0_0 = arith.constant 0 : index
    %0 = vector.load %arg1[%c0, %c0_0] : memref<16x32xbf16, #tpu.memory_space<vmem>>, vector<16x32xbf16>
    %c0_1 = arith.constant 0 : index
    %c0_2 = arith.constant 0 : index
    %1 = vector.load %arg2[%c0_1, %c0_2] : memref<32x32xbf16, #tpu.memory_space<vmem>>, vector<32x32xbf16>
    %cst = arith.constant dense<0.000000e+00> : vector<16x32xf32>
    %2 = tpu.matmul %0, %1, %cst {dimension_numbers = #tpu.dot_dimension_numbers<[1], [1], [0], [0], [0, 0, 1, 0], [], []>} : vector<16x32xbf16>, vector<32x32xbf16>, vector<16x32xf32> -> vector<16x32xf32>
    %c0_3 = arith.constant 0 : index
    %c0_4 = arith.constant 0 : index
    %3 = vector.load %arg3[%c0_3, %c0_4] : memref<1x32xf32, #tpu.memory_space<vmem>>, vector<1x32xf32>
    %4 = vector.broadcast %3 : vector<1x32xf32> to vector<16x32xf32>
    %5 = arith.addf %2, %4 : vector<16x32xf32>
    %c0_5 = arith.constant 0 : index
    %c0_6 = arith.constant 0 : index
    %6 = vector.load %arg4[%c0_5, %c0_6] : memref<16x32xbf16, #tpu.memory_space<vmem>>, vector<16x32xbf16>
    %7 = arith.extf %6 : vector<16x32xbf16> to vector<16x32xf32>
    %8 = arith.addf %5, %7 : vector<16x32xf32>
    %cst_7 = arith.constant dense<0.000000e+00> : vector<16xf32>
    %9 = vector.multi_reduction <add>, %8, %cst_7 [1] : vector<16x32xf32> to vector<16xf32>
    %10 = vector.shape_cast %9 : vector<16xf32> to vector<16x1xf32>
    %cst_8 = arith.constant 3.200000e+01 : f32
    %11 = vector.broadcast %cst_8 : f32 to vector<16x1xf32>
    %12 = arith.divf %10, %11 : vector<16x1xf32>
    %13 = vector.broadcast %12 : vector<16x1xf32> to vector<16x32xf32>
    %14 = arith.subf %8, %13 : vector<16x32xf32>
    %15 = arith.mulf %14, %14 : vector<16x32xf32>
    %cst_9 = arith.constant dense<0.000000e+00> : vector<16xf32>
    %16 = vector.multi_reduction <add>, %15, %cst_9 [1] : vector<16x32xf32> to vector<16xf32>
    %17 = vector.shape_cast %16 : vector<16xf32> to vector<16x1xf32>
    %cst_10 = arith.constant 3.200000e+01 : f32
    %18 = vector.broadcast %cst_10 : f32 to vector<16x1xf32>
    %19 = arith.divf %17, %18 : vector<16x1xf32>
    %cst_11 = arith.constant 9.99999996E-13 : f32
    %20 = vector.broadcast %cst_11 : f32 to vector<16x1xf32>
    %21 = arith.addf %19, %20 : vector<16x1xf32>
    %22 = math.rsqrt %21 : vector<16x1xf32>
    %23 = vector.broadcast %22 : vector<16x1xf32> to vector<16x32xf32>
    %24 = arith.mulf %14, %23 : vector<16x32xf32>
    %c0_12 = arith.constant 0 : index
    %c0_13 = arith.constant 0 : index
    %25 = vector.load %arg5[%c0_12, %c0_13] : memref<1x32xf32, #tpu.memory_space<vmem>>, vector<1x32xf32>
    %26 = vector.broadcast %25 : vector<1x32xf32> to vector<16x32xf32>
    %27 = arith.mulf %24, %26 : vector<16x32xf32>
    %c0_14 = arith.constant 0 : index
    %c0_15 = arith.constant 0 : index
    %28 = vector.load %arg6[%c0_14, %c0_15] : memref<1x32xf32, #tpu.memory_space<vmem>>, vector<1x32xf32>
    %29 = vector.broadcast %28 : vector<1x32xf32> to vector<16x32xf32>
    %30 = arith.addf %27, %29 : vector<16x32xf32>
    %31 = arith.truncf %30 : vector<16x32xf32> to vector<16x32xbf16>
    %c0_16 = arith.constant 0 : index
    %c0_17 = arith.constant 0 : index
    %32 = vector.load %arg7[%c0_16, %c0_17] : memref<16x32xbf16, #tpu.memory_space<vmem>>, vector<16x32xbf16>
    tpu.vector_store %arg7[%c0_16, %c0_17], %31 {strides = array<i32>} : memref<16x32xbf16, #tpu.memory_space<vmem>>, vector<16x32xbf16>,
    return
  }
  func.func @transform_0(%arg0: i32) -> (i32, i32) {
    %c0_i32 = arith.constant 0 : i32
    %c0_i32_0 = arith.constant 0 : i32
    return %arg0, %c0_i32 : i32, i32
  }
  func.func @transform_1(%arg0: i32) -> (i32, i32) {
    %c0_i32 = arith.constant 0 : i32
    %c0_i32_0 = arith.constant 0 : i32
    %c0_i32_1 = arith.constant 0 : i32
    return %c0_i32, %c0_i32_0 : i32, i32
  }
  func.func @transform_2(%arg0: i32) -> (i32, i32) {
    %c0_i32 = arith.constant 0 : i32
    %c0_i32_0 = arith.constant 0 : i32
    %c0_i32_1 = arith.constant 0 : i32
    return %c0_i32, %c0_i32_0 : i32, i32
  }
  func.func @transform_3(%arg0: i32) -> (i32, i32) {
    %c0_i32 = arith.constant 0 : i32
    %c0_i32_0 = arith.constant 0 : i32
    return %arg0, %c0_i32 : i32, i32
  }
  func.func @transform_4(%arg0: i32) -> (i32, i32) {
    %c0_i32 = arith.constant 0 : i32
    %c0_i32_0 = arith.constant 0 : i32
    %c0_i32_1 = arith.constant 0 : i32
    return %c0_i32, %c0_i32_0 : i32, i32
  }
  func.func @transform_5(%arg0: i32) -> (i32, i32) {
    %c0_i32 = arith.constant 0 : i32
    %c0_i32_0 = arith.constant 0 : i32
    %c0_i32_1 = arith.constant 0 : i32
    return %c0_i32, %c0_i32_0 : i32, i32
  }
  func.func @transform_6(%arg0: i32) -> (i32, i32) {
    %c0_i32 = arith.constant 0 : i32
    %c0_i32_0 = arith.constant 0 : i32
    return %arg0, %c0_i32 : i32, i32
  }
}

module attributes {stable_mosaic.version = 11 : i64} {
  func.func @_bert_self_output_kernel(%arg0: i32, %arg1: memref<16x32xbf16, #tpu.memory_space<vmem>>, %arg2: memref<32x32xbf16, #tpu.memory_space<vmem>>, %arg3: memref<1x32xf32, #tpu.memory_space<vmem>>, %arg4: memref<16x32xbf16, #tpu.memory_space<vmem>>, %arg5: memref<1x32xf32, #tpu.memory_space<vmem>>, %arg6: memref<1x32xf32, #tpu.memory_space<vmem>>, %arg7: memref<16x32xbf16, #tpu.memory_space<vmem>>) attributes {dimension_semantics = [#tpu.dimension_semantics<parallel>], iteration_bounds = array<i64: 1>, scalar_prefetch = 0 : i64, scratch_operands = 0 : i64, tpu.core_type = #tpu.core_type<tc>, window_params = [{transform_indices = @transform_0, window_bounds = array<i64: 16, 32>}, {pipeline_mode = #tpu.pipeline_mode<synchronous>, transform_indices = @transform_1, window_bounds = array<i64: 32, 32>}, {pipeline_mode = #tpu.pipeline_mode<synchronous>, transform_indices = @transform_2, window_bounds = array<i64: 1, 32>}, {transform_indices = @transform_3, window_bounds = array<i64: 16, 32>}, {pipeline_mode = #tpu.pipeline_mode<synchronous>, transform_indices = @transform_4, window_bounds = array<i64: 1, 32>}, {pipeline_mode = #tpu.pipeline_mode<synchronous>, transform_indices = @transform_5, window_bounds = array<i64: 1, 32>}, {transform_indices = @transform_6, window_bounds = array<i64: 16, 32>}]} {
    %c0 = arith.constant 0 : index
    %c0_0 = arith.constant 0 : index
    %0 = vector.load %arg1[%c0, %c0_0] : memref<16x32xbf16, #tpu.memory_space<vmem>>, vector<16x32xbf16>
    %c0_1 = arith.constant 0 : index
    %c0_2 = arith.constant 0 : index
    %1 = vector.load %arg2[%c0_1, %c0_2] : memref<32x32xbf16, #tpu.memory_space<vmem>>, vector<32x32xbf16>
    %cst = arith.constant dense<0.000000e+00> : vector<16x32xf32>
    %2 = tpu.matmul %0, %1, %cst {dimension_numbers = #tpu.dot_dimension_numbers<[1], [1], [0], [0], [0, 0, 1, 0], [], []>} : vector<16x32xbf16>, vector<32x32xbf16>, vector<16x32xf32> -> vector<16x32xf32>
    %c0_3 = arith.constant 0 : index
    %c0_4 = arith.constant 0 : index
    %3 = vector.load %arg3[%c0_3, %c0_4] : memref<1x32xf32, #tpu.memory_space<vmem>>, vector<1x32xf32>
    %4 = vector.broadcast %3 : vector<1x32xf32> to vector<16x32xf32>
    %5 = arith.addf %2, %4 : vector<16x32xf32>
    %c0_5 = arith.constant 0 : index
    %c0_6 = arith.constant 0 : index
    %6 = vector.load %arg4[%c0_5, %c0_6] : memref<16x32xbf16, #tpu.memory_space<vmem>>, vector<16x32xbf16>
    %7 = arith.extf %6 : vector<16x32xbf16> to vector<16x32xf32>
    %8 = arith.addf %5, %7 : vector<16x32xf32>
    %cst_7 = arith.constant dense<0.000000e+00> : vector<16xf32>
    %9 = vector.multi_reduction <add>, %8, %cst_7 [1] : vector<16x32xf32> to vector<16xf32>
    %10 = vector.shape_cast %9 : vector<16xf32> to vector<16x1xf32>
    %cst_8 = arith.constant 3.200000e+01 : f32
    %11 = vector.broadcast %cst_8 : f32 to vector<16x1xf32>
    %12 = arith.divf %10, %11 : vector<16x1xf32>
    %13 = vector.broadcast %12 : vector<16x1xf32> to vector<16x32xf32>
    %14 = arith.subf %8, %13 : vector<16x32xf32>
    %15 = arith.mulf %14, %14 : vector<16x32xf32>
    %cst_9 = arith.constant dense<0.000000e+00> : vector<16xf32>
    %16 = vector.multi_reduction <add>, %15, %cst_9 [1] : vector<16x32xf32> to vector<16xf32>
    %17 = vector.shape_cast %16 : vector<16xf32> to vector<16x1xf32>
    %cst_10 = arith.constant 3.200000e+01 : f32
    %18 = vector.broadcast %cst_10 : f32 to vector<16x1xf32>
    %19 = arith.divf %17, %18 : vector<16x1xf32>
    %cst_11 = arith.constant 9.99999996E-13 : f32
    %20 = vector.broadcast %cst_11 : f32 to vector<16x1xf32>
    %21 = arith.addf %19, %20 : vector<16x1xf32>
    %22 = math.rsqrt %21 : vector<16x1xf32>
    %23 = vector.broadcast %22 : vector<16x1xf32> to vector<16x32xf32>
    %24 = arith.mulf %14, %23 : vector<16x32xf32>
    %c0_12 = arith.constant 0 : index
    %c0_13 = arith.constant 0 : index
    %25 = vector.load %arg5[%c0_12, %c0_13] : memref<1x32xf32, #tpu.memory_space<vmem>>, vector<1x32xf32>
    %26 = vector.broadcast %25 : vector<1x32xf32> to vector<16x32xf32>
    %27 = arith.mulf %24, %26 : vector<16x32xf32>
    %c0_14 = arith.constant 0 : index
    %c0_15 = arith.constant 0 : index
    %28 = vector.load %arg6[%c0_14, %c0_15] : memref<1x32xf32, #tpu.memory_space<vmem>>, vector<1x32xf32>
    %29 = vector.broadcast %28 : vector<1x32xf32> to vector<16x32xf32>
    %30 = arith.addf %27, %29 : vector<16x32xf32>
    %31 = arith.truncf %30 : vector<16x32xf32> to vector<16x32xbf16>
    %c0_16 = arith.constant 0 : index
    %c0_17 = arith.constant 0 : index
    %32 = vector.load %arg7[%c0_16, %c0_17] : memref<16x32xbf16, #tpu.memory_space<vmem>>, vector<16x32xbf16>
    tpu.vector_store %arg7[%c0_16, %c0_17], %31 {strides = array<i32>} : memref<16x32xbf16, #tpu.memory_space<vmem>>, vector<16x32xbf16>,
    return
  }
  func.func @transform_0(%arg0: i32) -> (i32, i32) {
    %c0_i32 = arith.constant 0 : i32
    %c0_i32_0 = arith.constant 0 : i32
    return %arg0, %c0_i32 : i32, i32
  }
  func.func @transform_1(%arg0: i32) -> (i32, i32) {
    %c0_i32 = arith.constant 0 : i32
    %c0_i32_0 = arith.constant 0 : i32
    %c0_i32_1 = arith.constant 0 : i32
    return %c0_i32, %c0_i32_0 : i32, i32
  }
  func.func @transform_2(%arg0: i32) -> (i32, i32) {
    %c0_i32 = arith.constant 0 : i32
    %c0_i32_0 = arith.constant 0 : i32
    %c0_i32_1 = arith.constant 0 : i32
    return %c0_i32, %c0_i32_0 : i32, i32
  }
  func.func @transform_3(%arg0: i32) -> (i32, i32) {
    %c0_i32 = arith.constant 0 : i32
    %c0_i32_0 = arith.constant 0 : i32
    return %arg0, %c0_i32 : i32, i32
  }
  func.func @transform_4(%arg0: i32) -> (i32, i32) {
    %c0_i32 = arith.constant 0 : i32
    %c0_i32_0 = arith.constant 0 : i32
    %c0_i32_1 = arith.constant 0 : i32
    return %c0_i32, %c0_i32_0 : i32, i32
  }
  func.func @transform_5(%arg0: i32) -> (i32, i32) {
    %c0_i32 = arith.constant 0 : i32
    %c0_i32_0 = arith.constant 0 : i32
    %c0_i32_1 = arith.constant 0 : i32
    return %c0_i32, %c0_i32_0 : i32, i32
  }
  func.func @transform_6(%arg0: i32) -> (i32, i32) {
    %c0_i32 = arith.constant 0 : i32
    %c0_i32_0 = arith.constant 0 : i32
    return %arg0, %c0_i32 : i32, i32
  }
}

</mosaic_0001>

<bundles_post_ra>
// kernel: tpu_custom_call.1
= control target key start
LH: loop header
LB: loop body
LE: loop exit
PB: predicated region body
PF: predicated region fallthrough
CT: control target
= control target key end

     0   :  { %11 = vsyncpa [#allocation3], 0  ;;  %s380_s0 = inlined_call_operand.vmem [shape: bf16[16,32], index: 0, kind: input, shape index: {}]   ;;  %s381_s1 = inlined_call_operand.vmem [shape: bf16[32,32], index: 1, kind: input, shape index: {}]   ;;  %s382_s2 = inlined_call_operand.vmem [shape: f32[1,32], index: 2, kind: input, shape index: {}]   ;;  %s383_s3 = inlined_call_operand.hbm [shape: bf16[16,32], index: 3, kind: input, shape index: {}, may-alias: {3,6}]   ;;  %s384_s4 = inlined_call_operand.vmem [shape: f32[1,32], index: 4, kind: input, shape index: {}]   ;;  %s385_s5 = inlined_call_operand.vmem [shape: f32[1,32], index: 5, kind: input, shape index: {}]   ;;  %s386_s6 = inlined_call_operand.hbm [shape: bf16[16,32], index: 6, kind: output, shape index: {}, may-alias: {3,6}]  }
   0x1   :  { %12 = vsyncpa [#allocation4], 0  ;;  %s284_s21 = smov [#allocation2]   ;;  %s236_s25 = scalar_lea.hbm %s383_s3, 128 }
   0x2   :  { %s24_s22 = sshll.u32 %s284_s21, 4  ;;  %p237_p0 = scmp.ne.s32.totalorder %s383_s3, %s236_s25  ;;  %s25_s22 = int_to_ptr.vmem [resolvable:$true] %s24_s22 }
   0x3   :  { %p240_p1 = scmp.lt.u32.totalorder %s236_s25, %s383_s3 }
   0x5   :  { %p242_p2 = pnand %p240_p1, %p237_p0 }
   0x7   :  { %245 = shalt.err (!%p242_p2)
}
   0x8   :  { %s246_s30 = scalar_lea.vmem %s25_s22, 128  ;;  %p251_p4 = scmp.lt.s32.totalorder %s25_s22, %s25_s22 }
   0x9   :  { %p247_p3 = scmp.ne.s32.totalorder %s25_s22, %s246_s30  ;;  %p252_p5 = scmp.lt.s32.totalorder %s246_s30, %s246_s30 }
   0xb   :  { %p253_p6 = por %p252_p5, %p251_p4 }
   0xd   :  { %p254_p7 = pnand %p253_p6, %p247_p3 }
   0xf   :  { %257 = shalt.err (!%p254_p7)
}
  0x10   :  { %s285_s7 = smov 64   ;;  %s286_s8 = smov 4  }
  0x11   :  { %30 = dma.hbm_to_vmem [thread:$0]  %s383_s3, 128, %s25_s22, [#allocation3], %s285_s7, %s285_s7, %s286_s8  }
  0x12   :  { %280 = dma.done.wait [#allocation3], 128  }
  0x13   :  { %281 = vsyncadd [#allocation3], 4294967168  ;;  %v287_v0 = vmov 0.0   ;;  %vm288_vm0 = vmmov 0   ;;  %vm67_vm1 = vcmask 261120   ;;  %v229_v1 = vld [vmem:[%s381_s1] sm:$0xff]  }
  0x14   :  { %215 = vmatprep.subr.bf16.mxu0 %v287_v0  ;;  %219 = vmatprep.mubr.msk.bf16.mxu0 %vm288_vm0, %v287_v0  ;;  %v72_v2 = vsel %vm67_vm1, %v229_v1, 0  ;;  %v230_v3 = vld [vmem:[%s381_s1 + $0x8] sm:$0xff]   ;;  %v231_v5 = vld [vmem:[%s380_s0] sm:$0xff]   ;;  %vm177_vm2 = vcmask 257024   ;;  %s289_s19 = smov [#allocation5]  }
  0x15   :  { %216 = vmatpush3.bf16.xpose.msra.mxu0 %v72_v2  ;;  %v75_v4 = vsel %vm67_vm1, %v230_v3, 0  ;;  %v209_v6 = vld [vmem:[#allocation2] sm:$0xff]   ;;  %s185_s20 = sshll.u32 %s289_s19, 4  ;;  %s186_s20 = int_to_ptr.vmem [resolvable:$true] %s185_s20 }
  0x16   :  { %217 = vmatprep.subr.bf16.mxu0 %v287_v0  ;;  %v197_v7 = vld [vmem:[%s382_s2] ss:$0 sm:$0xff]  ;;  %v210_v8 = vunpack.c.l.bf16 %v209_v6  ;;  %v211_v12 = vunpack.c.h.bf16 %v209_v6  ;;  %p263_p9 = scmp.lt.s32.totalorder %s186_s20, %s186_s20 }
  0x17   :  { %v202_v37 = vld [vmem:[%s384_s4] ss:$0 sm:$0xff]  ;;  %s258_s4 = scalar_lea.vmem %s186_s20, 128 }
  0x18   :  { %v203_v39 = vld [vmem:[%s385_s5] ss:$0 sm:$0xff]  ;;  %p259_p8 = scmp.ne.s32.totalorder %s186_s20, %s258_s4  ;;  %p264_p10 = scmp.lt.s32.totalorder %s258_s4, %s258_s4 }
  0x1a   :  { %p265_p11 = por %p264_p10, %p263_p9 }
  0x1c   :  { %p266_p12 = pnand %p265_p11, %p259_p8 }
  0x1d   :  { %218 = vmatpush3.bf16.xpose.msra.mxu0 %v75_v4 }
  0x24   :  { %220 = vmatmul.mubr.msk.bf16.vlgmr.msra.gmra.mrb[0].mxu0 %vm67_vm1, %v231_v5 }
  0xf7   :  { %v111_v9 = vpop.f32.mrb[0].mxu0 }
  0xf8   :  { %v112_v10 = vadd.f32 %v197_v7, %v111_v9  ;;  %v221_v11 = vpop.f32.mrb[1].mxu0 }
  0xf9   :  { %v114_v13 = vpop.f32.mrb[2].mxu0 }
  0xfa   :  { %v115_v14 = vadd.f32 %v197_v7, %v114_v13  ;;  %v222_v15 = vpop.f32.mrb[3].mxu0  ;;  %v122_v16 = vadd.f32 %v210_v8, %v112_v10 }
  0xfc   :  { %v124_v17 = vsel %vm67_vm1, %v122_v16, 0.0  ;;  %v123_v18 = vadd.f32 %v211_v12, %v115_v14 }
  0xfd   :  { %125 = vadd.xlane.f32.xlu0 %v124_v17 }
  0xfe   :  { %v127_v19 = vsel %vm67_vm1, %v123_v18, 0.0 }
 0x101   :  { %128 = vadd.xlane.f32.xlu0 %v127_v19 }
 0x18a   :  { %v126_v20 = vpop.xlane.xlu0 %125 }
 0x18b   :  { %v131_v21 = vmul.f32 0.03125, %v126_v20 }
 0x18d   :  { %v133_v22 = vsub.f32 %v122_v16, %v131_v21 }
 0x18e   :  { %v129_v23 = vpop.xlane.xlu0 %128 }
 0x18f   :  { %v132_v24 = vmul.f32 0.03125, %v129_v23  ;;  %v135_v25 = vmul.f32 %v133_v22, %v133_v22 }
 0x191   :  { %v134_v26 = vsub.f32 %v123_v18, %v132_v24  ;;  %v137_v27 = vsel %vm67_vm1, %v135_v25, 0.0 }
 0x192   :  { %138 = vadd.xlane.f32.xlu1 %v137_v27 }
 0x193   :  { %v136_v28 = vmul.f32 %v134_v26, %v134_v26 }
 0x195   :  { %v140_v29 = vsel %vm67_vm1, %v136_v28, 0.0 }
 0x196   :  { %141 = vadd.xlane.f32.xlu1 %v140_v29 }
 0x21f   :  { %v139_v30 = vpop.xlane.xlu1 %138 }
 0x220   :  { %v143_v31 = vmul.f32 0.03125, %v139_v30 }
 0x222   :  { %v145_v32 = vadd.f32 1e-12, %v143_v31 }
 0x223   :  { %v142_v33 = vpop.xlane.xlu1 %141 }
 0x224   :  { %232 = vrsqrt.f32 %v145_v32  ;;  %v144_v34 = vmul.f32 0.03125, %v142_v33 }
 0x226   :  { %v146_v35 = vadd.f32 1e-12, %v144_v34 }
 0x228   :  { %234 = vrsqrt.f32 %v146_v35 }
 0x22e   :  { %v233_v36 = vpop.eup %232 }
 0x22f   :  { %v149_v38 = vmul.f32 %v233_v36, %v133_v22 }
 0x231   :  { %v158_v40 = vmul.f32 %v202_v37, %v149_v38 }
 0x232   :  { %v235_v41 = vpop.eup %234 }
 0x233   :  { %v150_v42 = vmul.f32 %v235_v41, %v134_v26  ;;  %v167_v43 = vadd.f32 %v203_v39, %v158_v40 }
 0x235   :  { %v159_v44 = vmul.f32 %v202_v37, %v150_v42  ;;  %v206_v45 = vpack.c.bf16 %v167_v43, %v167_v43 }
 0x237   :  { %v168_v46 = vadd.f32 %v203_v39, %v159_v44  ;;  %178 = vst.msk [vmem:[#allocation5] sm:$0xf] %vm177_vm2, %v206_v45 }
 0x239   :  { %v207_v47 = vpack.c.bf16 %v168_v46, %v168_v46 }
 0x23b   :  { %179 = vst.msk [vmem:[#allocation5 + $0x4] sm:$0xf] %vm177_vm2, %v207_v47 }
 0x23c   :  { %269 = shalt.err (!%p266_p12)
}
 0x23d   :  { %s270_s22 = scalar_lea.hbm %s386_s6, 128 }
 0x23e   :  { %p271_p13 = scmp.ne.s32.totalorder %s386_s6, %s270_s22  ;;  %p274_p0 = scmp.lt.u32.totalorder %s270_s22, %s386_s6 }
 0x240   :  { %p276_p1 = pnand %p274_p0, %p271_p13 }
 0x242   :  { %279 = shalt.err (!%p276_p1)
}
 0x243   :  { %191 = dma.vmem_to_hbm [thread:$0]  %s186_s20, 128, %s386_s6, [#allocation4], %s285_s7, %s285_s7, %s286_s8  }
 0x244   :  { %282 = dma.done.wait [#allocation4], 128  }
 0x245   :  { %283 = vsyncadd [#allocation4], 4294967168 }
 0x246   :  { %195 = vsyncpa [#allocation3], 1 }
 0x247   :  { %196 = vsyncpa [#allocation4], 1 }

// kernel: tpu_custom_call.1
= control target key start
LH: loop header
LB: loop body
LE: loop exit
PB: predicated region body
PF: predicated region fallthrough
CT: control target
= control target key end

     0   :  { %11 = vsyncpa [#allocation3], 0  ;;  %s380_s0 = inlined_call_operand.vmem [shape: bf16[16,32], index: 0, kind: input, shape index: {}]   ;;  %s381_s1 = inlined_call_operand.vmem [shape: bf16[32,32], index: 1, kind: input, shape index: {}]   ;;  %s382_s2 = inlined_call_operand.vmem [shape: f32[1,32], index: 2, kind: input, shape index: {}]   ;;  %s383_s3 = inlined_call_operand.hbm [shape: bf16[16,32], index: 3, kind: input, shape index: {}, may-alias: {3,6}]   ;;  %s384_s4 = inlined_call_operand.vmem [shape: f32[1,32], index: 4, kind: input, shape index: {}]   ;;  %s385_s5 = inlined_call_operand.vmem [shape: f32[1,32], index: 5, kind: input, shape index: {}]   ;;  %s386_s6 = inlined_call_operand.hbm [shape: bf16[16,32], index: 6, kind: output, shape index: {}, may-alias: {3,6}]  }
   0x1   :  { %12 = vsyncpa [#allocation4], 0  ;;  %s284_s21 = smov [#allocation2]   ;;  %s236_s25 = scalar_lea.hbm %s383_s3, 128 }
   0x2   :  { %s24_s22 = sshll.u32 %s284_s21, 4  ;;  %p237_p0 = scmp.ne.s32.totalorder %s383_s3, %s236_s25  ;;  %s25_s22 = int_to_ptr.vmem [resolvable:$true] %s24_s22 }
   0x3   :  { %p240_p1 = scmp.lt.u32.totalorder %s236_s25, %s383_s3 }
   0x5   :  { %p242_p2 = pnand %p240_p1, %p237_p0 }
   0x7   :  { %245 = shalt.err (!%p242_p2)
}
   0x8   :  { %s246_s30 = scalar_lea.vmem %s25_s22, 128  ;;  %p251_p4 = scmp.lt.s32.totalorder %s25_s22, %s25_s22 }
   0x9   :  { %p247_p3 = scmp.ne.s32.totalorder %s25_s22, %s246_s30  ;;  %p252_p5 = scmp.lt.s32.totalorder %s246_s30, %s246_s30 }
   0xb   :  { %p253_p6 = por %p252_p5, %p251_p4 }
   0xd   :  { %p254_p7 = pnand %p253_p6, %p247_p3 }
   0xf   :  { %257 = shalt.err (!%p254_p7)
}
  0x10   :  { %s285_s7 = smov 64   ;;  %s286_s8 = smov 4  }
  0x11   :  { %30 = dma.hbm_to_vmem [thread:$0]  %s383_s3, 128, %s25_s22, [#allocation3], %s285_s7, %s285_s7, %s286_s8  }
  0x12   :  { %280 = dma.done.wait [#allocation3], 128  }
  0x13   :  { %281 = vsyncadd [#allocation3], 4294967168  ;;  %v287_v0 = vmov 0.0   ;;  %vm288_vm0 = vmmov 0   ;;  %vm67_vm1 = vcmask 261120   ;;  %v229_v1 = vld [vmem:[%s381_s1] sm:$0xff]  }
  0x14   :  { %215 = vmatprep.subr.bf16.mxu0 %v287_v0  ;;  %219 = vmatprep.mubr.msk.bf16.mxu0 %vm288_vm0, %v287_v0  ;;  %v72_v2 = vsel %vm67_vm1, %v229_v1, 0  ;;  %v230_v3 = vld [vmem:[%s381_s1 + $0x8] sm:$0xff]   ;;  %v231_v5 = vld [vmem:[%s380_s0] sm:$0xff]   ;;  %vm177_vm2 = vcmask 257024   ;;  %s289_s19 = smov [#allocation5]  }
  0x15   :  { %216 = vmatpush3.bf16.xpose.msra.mxu0 %v72_v2  ;;  %v75_v4 = vsel %vm67_vm1, %v230_v3, 0  ;;  %v209_v6 = vld [vmem:[#allocation2] sm:$0xff]   ;;  %s185_s20 = sshll.u32 %s289_s19, 4  ;;  %s186_s20 = int_to_ptr.vmem [resolvable:$true] %s185_s20 }
  0x16   :  { %217 = vmatprep.subr.bf16.mxu0 %v287_v0  ;;  %v197_v7 = vld [vmem:[%s382_s2] ss:$0 sm:$0xff]  ;;  %v210_v8 = vunpack.c.l.bf16 %v209_v6  ;;  %v211_v12 = vunpack.c.h.bf16 %v209_v6  ;;  %p263_p9 = scmp.lt.s32.totalorder %s186_s20, %s186_s20 }
  0x17   :  { %v202_v37 = vld [vmem:[%s384_s4] ss:$0 sm:$0xff]  ;;  %s258_s4 = scalar_lea.vmem %s186_s20, 128 }
  0x18   :  { %v203_v39 = vld [vmem:[%s385_s5] ss:$0 sm:$0xff]  ;;  %p259_p8 = scmp.ne.s32.totalorder %s186_s20, %s258_s4  ;;  %p264_p10 = scmp.lt.s32.totalorder %s258_s4, %s258_s4 }
  0x1a   :  { %p265_p11 = por %p264_p10, %p263_p9 }
  0x1c   :  { %p266_p12 = pnand %p265_p11, %p259_p8 }
  0x1d   :  { %218 = vmatpush3.bf16.xpose.msra.mxu0 %v75_v4 }
  0x24   :  { %220 = vmatmul.mubr.msk.bf16.vlgmr.msra.gmra.mrb[0].mxu0 %vm67_vm1, %v231_v5 }
  0xf7   :  { %v111_v9 = vpop.f32.mrb[0].mxu0 }
  0xf8   :  { %v112_v10 = vadd.f32 %v197_v7, %v111_v9  ;;  %v221_v11 = vpop.f32.mrb[1].mxu0 }
  0xf9   :  { %v114_v13 = vpop.f32.mrb[2].mxu0 }
  0xfa   :  { %v115_v14 = vadd.f32 %v197_v7, %v114_v13  ;;  %v222_v15 = vpop.f32.mrb[3].mxu0  ;;  %v122_v16 = vadd.f32 %v210_v8, %v112_v10 }
  0xfc   :  { %v124_v17 = vsel %vm67_vm1, %v122_v16, 0.0  ;;  %v123_v18 = vadd.f32 %v211_v12, %v115_v14 }
  0xfd   :  { %125 = vadd.xlane.f32.xlu0 %v124_v17 }
  0xfe   :  { %v127_v19 = vsel %vm67_vm1, %v123_v18, 0.0 }
 0x101   :  { %128 = vadd.xlane.f32.xlu0 %v127_v19 }
 0x18a   :  { %v126_v20 = vpop.xlane.xlu0 %125 }
 0x18b   :  { %v131_v21 = vmul.f32 0.03125, %v126_v20 }
 0x18d   :  { %v133_v22 = vsub.f32 %v122_v16, %v131_v21 }
 0x18e   :  { %v129_v23 = vpop.xlane.xlu0 %128 }
 0x18f   :  { %v132_v24 = vmul.f32 0.03125, %v129_v23  ;;  %v135_v25 = vmul.f32 %v133_v22, %v133_v22 }
 0x191   :  { %v134_v26 = vsub.f32 %v123_v18, %v132_v24  ;;  %v137_v27 = vsel %vm67_vm1, %v135_v25, 0.0 }
 0x192   :  { %138 = vadd.xlane.f32.xlu1 %v137_v27 }
 0x193   :  { %v136_v28 = vmul.f32 %v134_v26, %v134_v26 }
 0x195   :  { %v140_v29 = vsel %vm67_vm1, %v136_v28, 0.0 }
 0x196   :  { %141 = vadd.xlane.f32.xlu1 %v140_v29 }
 0x21f   :  { %v139_v30 = vpop.xlane.xlu1 %138 }
 0x220   :  { %v143_v31 = vmul.f32 0.03125, %v139_v30 }
 0x222   :  { %v145_v32 = vadd.f32 1e-12, %v143_v31 }
 0x223   :  { %v142_v33 = vpop.xlane.xlu1 %141 }
 0x224   :  { %232 = vrsqrt.f32 %v145_v32  ;;  %v144_v34 = vmul.f32 0.03125, %v142_v33 }
 0x226   :  { %v146_v35 = vadd.f32 1e-12, %v144_v34 }
 0x228   :  { %234 = vrsqrt.f32 %v146_v35 }
 0x22e   :  { %v233_v36 = vpop.eup %232 }
 0x22f   :  { %v149_v38 = vmul.f32 %v233_v36, %v133_v22 }
 0x231   :  { %v158_v40 = vmul.f32 %v202_v37, %v149_v38 }
 0x232   :  { %v235_v41 = vpop.eup %234 }
 0x233   :  { %v150_v42 = vmul.f32 %v235_v41, %v134_v26  ;;  %v167_v43 = vadd.f32 %v203_v39, %v158_v40 }
 0x235   :  { %v159_v44 = vmul.f32 %v202_v37, %v150_v42  ;;  %v206_v45 = vpack.c.bf16 %v167_v43, %v167_v43 }
 0x237   :  { %v168_v46 = vadd.f32 %v203_v39, %v159_v44  ;;  %178 = vst.msk [vmem:[#allocation5] sm:$0xf] %vm177_vm2, %v206_v45 }
 0x239   :  { %v207_v47 = vpack.c.bf16 %v168_v46, %v168_v46 }
 0x23b   :  { %179 = vst.msk [vmem:[#allocation5 + $0x4] sm:$0xf] %vm177_vm2, %v207_v47 }
 0x23c   :  { %269 = shalt.err (!%p266_p12)
}
 0x23d   :  { %s270_s22 = scalar_lea.hbm %s386_s6, 128 }
 0x23e   :  { %p271_p13 = scmp.ne.s32.totalorder %s386_s6, %s270_s22  ;;  %p274_p0 = scmp.lt.u32.totalorder %s270_s22, %s386_s6 }
 0x240   :  { %p276_p1 = pnand %p274_p0, %p271_p13 }
 0x242   :  { %279 = shalt.err (!%p276_p1)
}
 0x243   :  { %191 = dma.vmem_to_hbm [thread:$0]  %s186_s20, 128, %s386_s6, [#allocation4], %s285_s7, %s285_s7, %s286_s8  }
 0x244   :  { %282 = dma.done.wait [#allocation4], 128  }
 0x245   :  { %283 = vsyncadd [#allocation4], 4294967168 }
 0x246   :  { %195 = vsyncpa [#allocation3], 1 }
 0x247   :  { %196 = vsyncpa [#allocation4], 1 }

</bundles_post_ra>
